<compile_context>
chip_gen: v6e
topology: v6e:2x2x1
jax: 0.10.0
libtpu: 0.0.40
codegen_flags: <defaults>
</compile_context>

<pallas_src>
import jax
import jax.numpy as jnp
from jax.experimental import pallas as pl
from jax.experimental.pallas import tpu as pltpu

_LANE = 128
_ROW_GROUP = 1024  # 8 sublane-groups of 128 rows -> legal lane-dense out block


def perceptron_kernel(x_ref, w_ref, b_ref, o_ref):
    # x_ref: (TB, D)          VMEM, native input dtype (streamed)
    # w_ref: (1, D)           VMEM, f32 (resident weight row)
    # b_ref: (1,)             SMEM, f32 (scalar bias)
    # o_ref: (TB//128, 128)   VMEM; row r, lane c  <->  batch row r*128 + c of this tile
    tb, d = x_ref.shape
    x = x_ref[...].astype(jnp.float32)
    # Free reshape: splits the sublane (row) dim into 128-row groups; the lane
    # (feature) dim is untouched, so no data movement.
    x3 = x.reshape(tb // _LANE, _LANE, d)
    prod = x3 * w_ref[...]                               # VPU broadcast-multiply
    logits = jnp.sum(prod, axis=-1)                      # reduce features -> (TB//128, 128)
    o_ref[...] = jax.nn.sigmoid(logits + b_ref[0]).astype(o_ref.dtype)  # EUP, lane-dense


def _round_up(x, m):
    return ((x + m - 1) // m) * m


def _vmem_capacity_bytes():
    try:
        cap = getattr(pltpu.get_tpu_info(), "vmem_capacity_bytes", None)
        if cap:
            return int(cap)
    except Exception:
        pass
    return 64 * 1024 * 1024  # conservative default: v7x per-TensorCore VMEM


def _choose_batch_tile(B, d_pad, itemsize, per_buffer_budget):
    if B <= _ROW_GROUP:
        # Single (possibly partial) block: block dims equal the full out-shape
        # dims, so any multiple of 128 is legal and minimizes over-allocation.
        return max(_LANE, _round_up(B, _LANE))
    rows = per_buffer_budget // (itemsize * d_pad)
    tb = max(_ROW_GROUP, (rows // _ROW_GROUP) * _ROW_GROUP)
    tb = min(tb, _round_up(B, _ROW_GROUP))               # don't allocate past B
    # Keep >= 2 grid steps when there is enough work so both v7x TensorCores
    # are fed via dimension_semantics=("parallel",).  Harmless on v5e/v6e.
    if B > 2 * _ROW_GROUP:
        tb = min(tb, _round_up(pl.cdiv(B, 2), _ROW_GROUP))
    return tb


def perceptron_forward(x, weight, bias):
    """sigmoid(x @ weight.T + bias).

    x:      (B, D)  any float dtype (streamed as-is)
    weight: (1, D)  (PyTorch nn.Linear(D, 1).weight layout)
    bias:   (1,)    (PyTorch nn.Linear(D, 1).bias layout)
    returns (B, 1)  in x.dtype
    """
    B, D = x.shape
    itemsize = jnp.dtype(x.dtype).itemsize
    w_row = jnp.reshape(weight, (1, D)).astype(jnp.float32)
    b_vec = jnp.reshape(bias, (1,)).astype(jnp.float32)

    vmem_cap = _vmem_capacity_bytes()
    # ~12.8 MiB per x buffer on v7x (64 MiB VMEM), 16 MiB on v5e/v6e (128 MiB).
    per_buffer_budget = min(16 << 20, max(4 << 20, vmem_cap // 5))
    d_pad = max(_LANE, _round_up(D, _LANE))              # VMEM pads lanes to 128
    tb = _choose_batch_tile(B, d_pad, itemsize, per_buffer_budget)

    num_blocks = pl.cdiv(B, tb)
    out_rows = num_blocks * (tb // _LANE)

    # Actual double-buffered footprint (+ margin), clamped to physical capacity.
    x_tile = tb * d_pad * itemsize
    out_tile = _round_up(tb // _LANE, 8) * _LANE * 4
    w_tile = 8 * d_pad * 4
    vmem_limit = 2 * (x_tile + out_tile + w_tile) + (4 << 20)
    vmem_limit = int(min(max(vmem_limit, 32 << 20), vmem_cap - (8 << 20)))

    out = pl.pallas_call(
        perceptron_kernel,
        out_shape=jax.ShapeDtypeStruct((out_rows, _LANE), x.dtype),
        grid_spec=pltpu.PrefetchScalarGridSpec(
            num_scalar_prefetch=0,
            grid=(num_blocks,),
            in_specs=[
                pl.BlockSpec((tb, D), lambda i: (i, 0)),              # streamed x tiles
                pl.BlockSpec((1, D), lambda i: (0, 0)),               # resident weight row
                pl.BlockSpec(memory_space=pltpu.MemorySpace.SMEM),    # scalar bias in SMEM
            ],
            out_specs=pl.BlockSpec((tb // _LANE, _LANE), lambda i: (i, 0)),
        ),
        compiler_params=pltpu.CompilerParams(
            dimension_semantics=("parallel",),            # megacore sharding on v7x
            vmem_limit_bytes=vmem_limit,
        ),
        cost_estimate=pl.CostEstimate(
            flops=2 * B * D,
            transcendentals=B,
            bytes_accessed=itemsize * B * D + 4 * (D + 1) + itemsize * out_rows * _LANE,
        ),
    )(x, w_row, b_vec)

    # Undo the lane-dense packing: flat index == batch index; drop padded tail.
    return out.reshape(-1)[:B].reshape(B, 1)


if __name__ == "__main__":
    batch, input_dim = 8, 32   # small shapes consistent with (batch, num_features)

    key = jax.random.PRNGKey(0)
    kx, kw, kb = jax.random.split(key, 3)

    x = jax.random.normal(kx, (batch, input_dim), dtype=jnp.float32)

    # nn.Linear-style init: U(-1/sqrt(D), 1/sqrt(D)); weight is (1, D), bias (1,).
    bound = 1.0 / (input_dim ** 0.5)
    weight = jax.random.uniform(kw, (1, input_dim), minval=-bound, maxval=bound,
                                dtype=jnp.float32)
    bias = jax.random.uniform(kb, (1,), minval=-bound, maxval=bound,
                              dtype=jnp.float32)

    out = perceptron_forward(x, weight, bias)
    out = jax.block_until_ready(out)

    # Reference check in plain JAX.
    ref = jax.nn.sigmoid(x @ weight.T + bias)
    assert out.shape == (batch, 1)
    assert jnp.allclose(out, ref, atol=1e-5, rtol=1e-5)

    print("KERNEL_OK")
</pallas_src>

<mosaic_0001>
module attributes {stable_mosaic.version = 11 : i64} {
  func.func @perceptron_kernel(%arg0: i32, %arg1: memref<128x32xf32, #tpu.memory_space<vmem>>, %arg2: memref<1x32xf32, #tpu.memory_space<vmem>>, %arg3: memref<1xf32, #tpu.memory_space<smem>>, %arg4: memref<1x128xf32, #tpu.memory_space<vmem>>) attributes {dimension_semantics = [#tpu.dimension_semantics<parallel>], iteration_bounds = array<i64: 1>, scalar_prefetch = 0 : i64, scratch_operands = 0 : i64, tpu.core_type = #tpu.core_type<tc>, window_params = [{transform_indices = @transform_0, window_bounds = array<i64: 128, 32>}, {pipeline_mode = #tpu.pipeline_mode<synchronous>, transform_indices = @transform_1, window_bounds = array<i64: 1, 32>}, {transform_indices = @transform_2, window_bounds = array<i64: 1>}, {transform_indices = @transform_3, window_bounds = array<i64: 1, 128>}]} {
    %c0 = arith.constant 0 : index
    %c0_0 = arith.constant 0 : index
    %0 = vector.load %arg1[%c0, %c0_0] : memref<128x32xf32, #tpu.memory_space<vmem>>, vector<128x32xf32>
    %1 = vector.shape_cast %0 : vector<128x32xf32> to vector<1x128x32xf32>
    %c0_1 = arith.constant 0 : index
    %c0_2 = arith.constant 0 : index
    %2 = vector.load %arg2[%c0_1, %c0_2] : memref<1x32xf32, #tpu.memory_space<vmem>>, vector<1x32xf32>
    %3 = vector.shape_cast %2 : vector<1x32xf32> to vector<1x1x32xf32>
    %4 = vector.broadcast %3 : vector<1x1x32xf32> to vector<1x128x32xf32>
    %5 = arith.mulf %1, %4 : vector<1x128x32xf32>
    %cst = arith.constant dense<0.000000e+00> : vector<1x128xf32>
    %6 = vector.multi_reduction <add>, %5, %cst [2] : vector<1x128x32xf32> to vector<1x128xf32>
    %c0_3 = arith.constant 0 : index
    %7 = memref.load %arg3[%c0_3] : memref<1xf32, #tpu.memory_space<smem>>
    %8 = vector.broadcast %7 : f32 to vector<1x128xf32>
    %9 = arith.addf %6, %8 : vector<1x128xf32>
    %10 = arith.negf %9 : vector<1x128xf32>
    %11 = math.exp %10 : vector<1x128xf32>
    %cst_4 = arith.constant 1.000000e+00 : f32
    %12 = vector.broadcast %cst_4 : f32 to vector<1x128xf32>
    %13 = arith.addf %12, %11 : vector<1x128xf32>
    %14 = arith.divf %12, %13 : vector<1x128xf32>
    %c0_5 = arith.constant 0 : index
    %c0_6 = arith.constant 0 : index
    %15 = vector.load %arg4[%c0_5, %c0_6] : memref<1x128xf32, #tpu.memory_space<vmem>>, vector<1x128xf32>
    tpu.vector_store %arg4[%c0_5, %c0_6], %14 {strides = array<i32>} : memref<1x128xf32, #tpu.memory_space<vmem>>, vector<1x128xf32>,
    return
  }
  func.func @transform_0(%arg0: i32) -> (i32, i32) {
    %c0_i32 = arith.constant 0 : i32
    %c0_i32_0 = arith.constant 0 : i32
    return %arg0, %c0_i32 : i32, i32
  }
  func.func @transform_1(%arg0: i32) -> (i32, i32) {
    %c0_i32 = arith.constant 0 : i32
    %c0_i32_0 = arith.constant 0 : i32
    %c0_i32_1 = arith.constant 0 : i32
    return %c0_i32, %c0_i32_0 : i32, i32
  }
  func.func @transform_2(%arg0: i32) -> i32 {
    %c0_i32 = arith.constant 0 : i32
    %c0_i32_0 = arith.constant 0 : i32
    return %c0_i32 : i32
  }
  func.func @transform_3(%arg0: i32) -> (i32, i32) {
    %c0_i32 = arith.constant 0 : i32
    %c0_i32_0 = arith.constant 0 : i32
    return %arg0, %c0_i32 : i32, i32
  }
}

</mosaic_0001>

<bundles_post_ra>
// kernel: tpu_custom_call.1
= control target key start
LH: loop header
LB: loop body
LE: loop exit
PB: predicated region body
PF: predicated region fallthrough
CT: control target
= control target key end

     0   :  { %9 = vsyncpa [#allocation4], 0  ;;  %s613_s0 = inlined_call_operand.hbm [shape: f32[8,32], index: 0, kind: input, shape index: {}]   ;;  %s614_s1 = inlined_call_operand.vmem [shape: f32[1,32], index: 1, kind: input, shape index: {}]   ;;  %s615_s2 = inlined_call_operand.<no memory space> [shape: f32[1], index: 2, kind: input, shape index: {}]   ;;  %s616_s3 = inlined_call_operand.hbm [shape: f32[1,128], index: 3, kind: output, shape index: {}]  }
   0x1   :  { %10 = vsyncpa [#allocation5], 0 }
   0x2   :  { %15 = vsyncadd [#allocation4], 1920  ;;  %s505_s12 = smov [#allocation3]  }
   0x3   :  { %s16_s13 = sshll.u32 %s505_s12, 4  ;;  %s17_s13 = int_to_ptr.vmem [resolvable:$true] %s16_s13 }
   0x4   :  { %s469_s14 = scalar_lea.vmem %s17_s13, 128  ;;  %s473_s15 = scalar_lea.vmem %s17_s13, 2048 }
   0x5   :  { %p470_p0 = scmp.ne.s32.totalorder %s17_s13, %s469_s14  ;;  %p474_p1 = scmp.lt.s32.totalorder %s17_s13, %s17_s13 }
   0x6   :  { %p475_p2 = scmp.lt.s32.totalorder %s473_s15, %s469_s14 }
   0x8   :  { %p476_p3 = por %p475_p2, %p474_p1 }
   0xa   :  { %p477_p4 = pnand %p476_p3, %p470_p0 }
   0xc   :  { %480 = shalt.err (!%p477_p4)
}
   0xd   :  { %s506_s16 = smov 128   ;;  %s507_s17 = smov 8  }
   0xe   :  { %22 = dma.hbm_to_vmem [thread:$0]  %s613_s0, 128, %s17_s13, [#allocation4], %s506_s16, %s506_s16, %s507_s17  }
   0xf   :  { %501 = dma.done.wait [#allocation4], 2048  }
  0x10   :  { %502 = vsyncadd [#allocation4], 4294965248  ;;  %v30_v0 = vld [vmem:[#allocation3] sm:$0xff]  ;;  %vm69_vm0 = vcmask 261120   ;;  %v32_v2 = vld [vmem:[#allocation3 + $0x10] sm:$0xff]  ;;  %v554_v49 = vstv %s615_s2  ;;  %vm259_vm1 = vcmask 130112  }
  0x11   :  { %v376_v1 = vld [vmem:[%s614_s1] ss:$0 sm:$0xff]  ;;  %v31_v5 = vld [vmem:[#allocation3 + $0x8] sm:$0xff]  ;;  %v33_v6 = vld [vmem:[#allocation3 + $0x18] sm:$0xff]  ;;  %vm266_vm2 = vcmask 195712   ;;  %vm273_vm3 = vcmask 261312  }
  0x12   :  { %v53_v3 = vmul.f32 %v376_v1, %v30_v0  ;;  %v55_v4 = vmul.f32 %v376_v1, %v32_v2  ;;  %v54_v7 = vmul.f32 %v376_v1, %v31_v5  ;;  %v56_v8 = vmul.f32 %v376_v1, %v33_v6  ;;  %v34_v9 = vld [vmem:[#allocation3 + $0x20] sm:$0xff]  ;;  %v35_v10 = vld [vmem:[#allocation3 + $0x28] sm:$0xff]  ;;  %v36_v17 = vld [vmem:[#allocation3 + $0x30] sm:$0xff]  ;;  %s508_s2 = smov [#allocation6]  }
  0x13   :  { %v57_v15 = vmul.f32 %v376_v1, %v34_v9  ;;  %v58_v16 = vmul.f32 %v376_v1, %v35_v10  ;;  %v37_v18 = vld [vmem:[#allocation3 + $0x38] sm:$0xff]  ;;  %v59_v21 = vmul.f32 %v376_v1, %v36_v17  ;;  %v38_v23 = vld [vmem:[#allocation3 + $0x40] sm:$0xff]  ;;  %v39_v24 = vld [vmem:[#allocation3 + $0x48] sm:$0xff]  ;;  %vm280_vm4 = vcmask 326912   ;;  %s367_s22 = sshll.u32 %s508_s2, 4  ;;  %s368_s22 = int_to_ptr.vmem [resolvable:$true] %s367_s22 }
  0x14   :  { %v70_v11 = vsel %vm69_vm0, %v53_v3, 0.0  ;;  %v76_v12 = vsel %vm69_vm0, %v55_v4, 0.0  ;;  %v73_v13 = vsel %vm69_vm0, %v54_v7, 0.0  ;;  %v79_v14 = vsel %vm69_vm0, %v56_v8, 0.0  ;;  %v40_v29 = vld [vmem:[#allocation3 + $0x50] sm:$0xff]  ;;  %v41_v30 = vld [vmem:[#allocation3 + $0x58] sm:$0xff]  ;;  %p486_p6 = scmp.lt.s32.totalorder %s368_s22, %s368_s22 }
  0x15   :  { %71 = vadd.xlane.f32.xlu0 %v70_v11  ;;  %77 = vadd.xlane.f32.xlu1 %v76_v12  ;;  %v82_v19 = vsel %vm69_vm0, %v57_v15, 0.0  ;;  %v85_v20 = vsel %vm69_vm0, %v58_v16, 0.0  ;;  %v60_v22 = vmul.f32 %v376_v1, %v37_v18  ;;  %v88_v25 = vsel %vm69_vm0, %v59_v21, 0.0  ;;  %v42_v35 = vld [vmem:[#allocation3 + $0x60] sm:$0xff]  ;;  %v43_v36 = vld [vmem:[#allocation3 + $0x68] sm:$0xff]  ;;  %v44_v41 = vld [vmem:[#allocation3 + $0x70] sm:$0xff] }
  0x16   :  { %v61_v27 = vmul.f32 %v376_v1, %v38_v23  ;;  %v62_v28 = vmul.f32 %v376_v1, %v39_v24  ;;  %v63_v33 = vmul.f32 %v376_v1, %v40_v29  ;;  %v64_v34 = vmul.f32 %v376_v1, %v41_v30  ;;  %v45_v42 = vld [vmem:[#allocation3 + $0x78] sm:$0xff]  ;;  %s481_s23 = scalar_lea.vmem %s368_s22, 16  ;;  %s485_s24 = scalar_lea.vmem %s368_s22, 32 }
  0x17   :  { %v91_v26 = vsel %vm69_vm0, %v60_v22, 0.0  ;;  %v65_v39 = vmul.f32 %v376_v1, %v42_v35  ;;  %v66_v40 = vmul.f32 %v376_v1, %v43_v36  ;;  %v67_v45 = vmul.f32 %v376_v1, %v44_v41  ;;  %p482_p5 = scmp.ne.s32.totalorder %s368_s22, %s481_s23  ;;  %p487_p7 = scmp.lt.s32.totalorder %s485_s24, %s481_s23 }
  0x18   :  { %v94_v31 = vsel %vm69_vm0, %v61_v27, 0.0  ;;  %v97_v32 = vsel %vm69_vm0, %v62_v28, 0.0  ;;  %v100_v37 = vsel %vm69_vm0, %v63_v33, 0.0  ;;  %v103_v38 = vsel %vm69_vm0, %v64_v34, 0.0 }
  0x19   :  { %74 = vadd.xlane.f32.xlu0 %v73_v13  ;;  %80 = vadd.xlane.f32.xlu1 %v79_v14  ;;  %v106_v43 = vsel %vm69_vm0, %v65_v39, 0.0  ;;  %v109_v44 = vsel %vm69_vm0, %v66_v40, 0.0  ;;  %v68_v46 = vmul.f32 %v376_v1, %v45_v42  ;;  %v112_v47 = vsel %vm69_vm0, %v67_v45, 0.0  ;;  %p488_p8 = por %p487_p7, %p486_p6 }
  0x1a   :  { %vm287_vm5 = vcmask 392512   ;;  %vm294_vm6 = vcmask 458112   ;;  %vm301_vm7 = vcmask 523712   ;;  %vm308_vm8 = vcmask 589312  }
  0x1b   :  { %v115_v48 = vsel %vm69_vm0, %v68_v46, 0.0  ;;  %vm315_vm9 = vcmask 654912   ;;  %vm322_vm10 = vcmask 720512   ;;  %vm329_vm11 = vcmask 786112   ;;  %p489_p9 = pnand %p488_p8, %p482_p5 }
  0x1c   :  { %vm336_vm12 = vcmask 851712   ;;  %vm343_vm13 = vcmask 917312   ;;  %vm350_vm14 = vcmask 982912   ;;  %vm357_vm15 = vcmask 1048512  }
  0x1d   :  { %83 = vadd.xlane.f32.xlu0 %v82_v19  ;;  %86 = vadd.xlane.f32.xlu1 %v85_v20 }
  0x21   :  { %89 = vadd.xlane.f32.xlu0 %v88_v25  ;;  %92 = vadd.xlane.f32.xlu1 %v91_v26  ;;  %v248_v25 = vlaneseq }
  0x23   :  { %v570_v36 = vand.u32 127, %v248_v25 }
  0x25   :  { %95 = vadd.xlane.f32.xlu0 %v94_v31  ;;  %98 = vadd.xlane.f32.xlu1 %v97_v32 }
  0x29   :  { %101 = vadd.xlane.f32.xlu0 %v100_v37  ;;  %104 = vadd.xlane.f32.xlu1 %v103_v38 }
  0x2d   :  { %107 = vadd.xlane.f32.xlu0 %v106_v43  ;;  %110 = vadd.xlane.f32.xlu1 %v109_v44 }
  0x31   :  { %113 = vadd.xlane.f32.xlu0 %v112_v47  ;;  %116 = vadd.xlane.f32.xlu1 %v115_v48  ;;  %v574_v47 = vshrl.u32 %v248_v25, 7  ;;  %v261_v48 = vadd.s32 4294967280, %v570_v36 }
  0x9e   :  { %v72_v50 = vpop.xlane.xlu0 %71  ;;  %v78_v51 = vpop.xlane.xlu1 %77 }
  0x9f   :  { %v120_v52 = vadd.f32 %v554_v49, %v72_v50  ;;  %v122_v53 = vadd.f32 %v554_v49, %v78_v51  ;;  %v254_v51 = vadd.s32 4294967288, %v570_v36 }
  0xa1   :  { %v377_v54 = vmul.f32 -1.442695, %v120_v52  ;;  %v379_v55 = vmul.f32 -1.442695, %v122_v53 }
  0xa2   :  { %v75_v56 = vpop.xlane.xlu0 %74  ;;  %v81_v57 = vpop.xlane.xlu1 %80 }
  0xa3   :  { %397 = vpow2.f32 %v377_v54  ;;  %v121_v58 = vadd.f32 %v554_v49, %v75_v56  ;;  %v123_v59 = vadd.f32 %v554_v49, %v81_v57  ;;  %v268_v54 = vadd.s32 4294967272, %v570_v36 }
  0xa4   :  { %399 = vpow2.f32 %v379_v55 }
  0xa5   :  { %v378_v60 = vmul.f32 -1.442695, %v121_v58  ;;  %v380_v61 = vmul.f32 -1.442695, %v123_v59  ;;  %v252_v59 = vsub.s32 %v570_v36, %v574_v47 }
  0xa6   :  { %v84_v62 = vpop.xlane.xlu0 %83  ;;  %v87_v63 = vpop.xlane.xlu1 %86 }
  0xa7   :  { %401 = vpow2.f32 %v378_v60  ;;  %v124_v0 = vadd.f32 %v554_v49, %v84_v62  ;;  %v125_v1 = vadd.f32 %v554_v49, %v87_v63  ;;  %v257_v60 = vsub.s32 %v254_v51, %v574_v47 }
  0xa8   :  { %403 = vpow2.f32 %v380_v61  ;;  %v264_v62 = vsub.s32 %v261_v48, %v574_v47  ;;  %v271_v63 = vsub.s32 %v268_v54, %v574_v47  ;;  %v324_v48 = vadd.s32 4294967208, %v570_v36 }
  0xa9   :  { %v381_v2 = vmul.f32 -1.442695, %v124_v0  ;;  %v382_v3 = vmul.f32 -1.442695, %v125_v1 }
  0xaa   :  { %v90_v4 = vpop.xlane.xlu0 %89  ;;  %v93_v5 = vpop.xlane.xlu1 %92 }
  0xab   :  { %405 = vpow2.f32 %v381_v2  ;;  %v126_v6 = vadd.f32 %v554_v49, %v90_v4  ;;  %v127_v7 = vadd.f32 %v554_v49, %v93_v5  ;;  %v282_v4 = vadd.s32 4294967256, %v570_v36 }
  0xac   :  { %407 = vpow2.f32 %v382_v3 }
  0xad   :  { %v383_v8 = vmul.f32 -1.442695, %v126_v6  ;;  %v384_v9 = vmul.f32 -1.442695, %v127_v7 }
  0xae   :  { %v96_v10 = vpop.xlane.xlu0 %95  ;;  %v99_v11 = vpop.xlane.xlu1 %98 }
  0xaf   :  { %409 = vpow2.f32 %v383_v8  ;;  %v128_v12 = vadd.f32 %v554_v49, %v96_v10  ;;  %v129_v13 = vadd.f32 %v554_v49, %v99_v11 }
  0xb0   :  { %v398_v14 = vpop.eup %397  ;;  %411 = vpow2.f32 %v384_v9  ;;  %v289_v9 = vadd.s32 4294967248, %v570_v36 }
  0xb1   :  { %v400_v15 = vpop.eup %399  ;;  %v184_v16 = vadd.f32 1.0, %v398_v14  ;;  %v385_v17 = vmul.f32 -1.442695, %v128_v12  ;;  %v386_v19 = vmul.f32 -1.442695, %v129_v13 }
  0xb2   :  { %v186_v18 = vadd.f32 1.0, %v400_v15  ;;  %v102_v20 = vpop.xlane.xlu0 %101  ;;  %v105_v21 = vpop.xlane.xlu1 %104 }
  0xb3   :  { %413 = vrcp.f32 %v184_v16  ;;  %v130_v22 = vadd.f32 %v554_v49, %v102_v20  ;;  %v131_v23 = vadd.f32 %v554_v49, %v105_v21 }
  0xb4   :  { %v402_v24 = vpop.eup %401  ;;  %415 = vrcp.f32 %v186_v18  ;;  %v285_v18 = vsub.s32 %v282_v4, %v574_v47  ;;  %v352_v4 = vadd.s32 4294967176, %v570_v36 }
  0xb5   :  { %v404_v26 = vpop.eup %403  ;;  %v185_v27 = vadd.f32 1.0, %v402_v24  ;;  %417 = vpow2.f32 %v385_v17  ;;  %v387_v28 = vmul.f32 -1.442695, %v130_v22  ;;  %v388_v30 = vmul.f32 -1.442695, %v131_v23 }
  0xb6   :  { %v187_v29 = vadd.f32 1.0, %v404_v26  ;;  %419 = vpow2.f32 %v386_v19  ;;  %v108_v31 = vpop.xlane.xlu0 %107  ;;  %v111_v32 = vpop.xlane.xlu1 %110  ;;  %v296_v19 = vadd.s32 4294967240, %v570_v36  ;;  %v292_v23 = vsub.s32 %v289_v9, %v574_v47 }
  0xb7   :  { %421 = vrcp.f32 %v185_v27  ;;  %v132_v33 = vadd.f32 %v554_v49, %v108_v31  ;;  %v133_v34 = vadd.f32 %v554_v49, %v111_v32  ;;  %v303_v27 = vadd.s32 4294967232, %v570_v36 }
  0xb8   :  { %v406_v35 = vpop.eup %405  ;;  %423 = vrcp.f32 %v187_v29  ;;  %v299_v32 = vsub.s32 %v296_v19, %v574_v47 }
  0xb9   :  { %v408_v37 = vpop.eup %407  ;;  %v188_v38 = vadd.f32 1.0, %v406_v35  ;;  %425 = vpow2.f32 %v387_v28  ;;  %v389_v39 = vmul.f32 -1.442695, %v132_v33  ;;  %v390_v41 = vmul.f32 -1.442695, %v133_v34 }
  0xba   :  { %v189_v40 = vadd.f32 1.0, %v408_v37  ;;  %427 = vpow2.f32 %v388_v30  ;;  %v114_v42 = vpop.xlane.xlu0 %113  ;;  %v117_v43 = vpop.xlane.xlu1 %116  ;;  %v310_v28 = vadd.s32 4294967224, %v570_v36 }
  0xbb   :  { %429 = vrcp.f32 %v188_v38  ;;  %v134_v44 = vadd.f32 %v554_v49, %v114_v42  ;;  %v135_v45 = vadd.f32 %v554_v49, %v117_v43  ;;  %v275_v49 = vadd.s32 4294967264, %v570_v36 }
  0xbc   :  { %v410_v46 = vpop.eup %409  ;;  %431 = vrcp.f32 %v189_v40  ;;  %v306_v40 = vsub.s32 %v303_v27, %v574_v47  ;;  %v317_v43 = vadd.s32 4294967216, %v570_v36 }
  0xbd   :  { %v412_v50 = vpop.eup %411  ;;  %v190_v52 = vadd.f32 1.0, %v410_v46  ;;  %433 = vpow2.f32 %v389_v39  ;;  %v391_v53 = vmul.f32 -1.442695, %v134_v44  ;;  %v392_v56 = vmul.f32 -1.442695, %v135_v45 }
  0xbe   :  { %v191_v55 = vadd.f32 1.0, %v412_v50  ;;  %435 = vpow2.f32 %v390_v41  ;;  %v278_v3 = vsub.s32 %v275_v49, %v574_v47  ;;  %v313_v41 = vsub.s32 %v310_v28, %v574_v47 }
  0xbf   :  { %437 = vrcp.f32 %v190_v52  ;;  %v320_v54 = vsub.s32 %v317_v43, %v574_v47  ;;  %v327_v49 = vsub.s32 %v324_v48, %v574_v47 }
  0xc0   :  { %v414_v57 = vpop.eup %413  ;;  %439 = vrcp.f32 %v191_v55  ;;  %v331_v55 = vadd.s32 4294967200, %v570_v36 }
  0xc1   :  { %v416_v58 = vpop.eup %415  ;;  %441 = vpow2.f32 %v391_v53  ;;  %v253_v7 = vrot.slane %v414_v57, %v252_v59 }
  0xc2   :  { %v418_v61 = vpop.eup %417  ;;  %443 = vpow2.f32 %v392_v56  ;;  %v265_v11 = vrot.slane %v416_v58, %v264_v62  ;;  %v338_v58 = vadd.s32 4294967192, %v570_v36 }
  0xc3   :  { %v420_v0 = vpop.eup %419  ;;  %v192_v1 = vadd.f32 1.0, %v418_v61 }
  0xc4   :  { %v422_v2 = vpop.eup %421  ;;  %v193_v5 = vadd.f32 1.0, %v420_v0  ;;  %v345_v0 = vadd.s32 4294967184, %v570_v36 }
  0xc5   :  { %v424_v6 = vpop.eup %423  ;;  %v258_v8 = vrot.slane %v422_v2, %v257_v60  ;;  %445 = vrcp.f32 %v192_v1 }
  0xc6   :  { %v426_v10 = vpop.eup %425  ;;  %v272_v12 = vrot.slane %v424_v6, %v271_v63  ;;  %447 = vrcp.f32 %v193_v5  ;;  %v334_v63 = vsub.s32 %v331_v55, %v574_v47  ;;  %v348_v9 = vsub.s32 %v345_v0, %v574_v47 }
  0xc7   :  { %v428_v13 = vpop.eup %427  ;;  %v260_v14 = vsel %vm259_vm1, %v258_v8, %v253_v7  ;;  %v194_v15 = vadd.f32 1.0, %v426_v10 }
  0xc8   :  { %v430_v16 = vpop.eup %429  ;;  %v267_v17 = vsel %vm266_vm2, %v265_v11, %v260_v14  ;;  %v195_v20 = vadd.f32 1.0, %v428_v13 }
  0xc9   :  { %v432_v21 = vpop.eup %431  ;;  %v279_v22 = vrot.slane %v430_v16, %v278_v3  ;;  %449 = vrcp.f32 %v194_v15  ;;  %v274_v25 = vsel %vm273_vm3, %v272_v12, %v267_v17  ;;  %v341_v3 = vsub.s32 %v338_v58, %v574_v47 }
  0xca   :  { %v434_v24 = vpop.eup %433  ;;  %451 = vrcp.f32 %v195_v20  ;;  %v286_v31 = vrot.slane %v432_v21, %v285_v18  ;;  %v355_v12 = vsub.s32 %v352_v4, %v574_v47 }
  0xcb   :  { %v436_v26 = vpop.eup %435  ;;  %v196_v29 = vadd.f32 1.0, %v434_v24  ;;  %v281_v35 = vsel %vm280_vm4, %v279_v22, %v274_v25 }
  0xcc   :  { %v438_v30 = vpop.eup %437  ;;  %v197_v33 = vadd.f32 1.0, %v436_v26  ;;  %v288_v44 = vsel %vm287_vm5, %v286_v31, %v281_v35 }
  0xcd   :  { %v440_v34 = vpop.eup %439  ;;  %v293_v37 = vrot.slane %v438_v30, %v292_v23  ;;  %453 = vrcp.f32 %v196_v29 }
  0xce   :  { %v442_v38 = vpop.eup %441  ;;  %455 = vrcp.f32 %v197_v33  ;;  %v300_v45 = vrot.slane %v440_v34, %v299_v32 }
  0xcf   :  { %v444_v39 = vpop.eup %443  ;;  %v198_v42 = vadd.f32 1.0, %v442_v38  ;;  %v295_v50 = vsel %vm294_vm6, %v293_v37, %v288_v44 }
  0xd0   :  { %v199_v46 = vadd.f32 1.0, %v444_v39  ;;  %v302_v57 = vsel %vm301_vm7, %v300_v45, %v295_v50 }
  0xd1   :  { %457 = vrcp.f32 %v198_v42 }
  0xd2   :  { %v446_v51 = vpop.eup %445  ;;  %459 = vrcp.f32 %v199_v46 }
  0xd3   :  { %v448_v52 = vpop.eup %447  ;;  %v307_v53 = vrot.slane %v446_v51, %v306_v40 }
  0xd4   :  { %v314_v56 = vrot.slane %v448_v52, %v313_v41 }
  0xd5   :  { %v309_v59 = vsel %vm308_vm8, %v307_v53, %v302_v57 }
  0xd6   :  { %v450_v60 = vpop.eup %449  ;;  %v316_v1 = vsel %vm315_vm9, %v314_v56, %v309_v59 }
  0xd7   :  { %v452_v61 = vpop.eup %451  ;;  %v321_v62 = vrot.slane %v450_v60, %v320_v54 }
  0xd8   :  { %v328_v2 = vrot.slane %v452_v61, %v327_v49 }
  0xd9   :  { %v323_v5 = vsel %vm322_vm10, %v321_v62, %v316_v1 }
  0xda   :  { %v454_v6 = vpop.eup %453  ;;  %v330_v10 = vsel %vm329_vm11, %v328_v2, %v323_v5 }
  0xdb   :  { %v456_v7 = vpop.eup %455  ;;  %v335_v8 = vrot.slane %v454_v6, %v334_v63 }
  0xdc   :  { %v342_v11 = vrot.slane %v456_v7, %v341_v3 }
  0xdd   :  { %v337_v13 = vsel %vm336_vm12, %v335_v8, %v330_v10 }
  0xde   :  { %v458_v14 = vpop.eup %457  ;;  %v344_v16 = vsel %vm343_vm13, %v342_v11, %v337_v13 }
  0xdf   :  { %v460_v15 = vpop.eup %459  ;;  %v349_v36 = vrot.slane %v458_v14, %v348_v9 }
  0xe0   :  { %v356_v17 = vrot.slane %v460_v15, %v355_v12 }
  0xe1   :  { %v351_v18 = vsel %vm350_vm14, %v349_v36, %v344_v16 }
  0xe2   :  { %v358_v19 = vsel %vm357_vm15, %v356_v17, %v351_v18 }
  0xe3   :  { %360 = vst [vmem:[#allocation6] sm:$0x1] %v358_v19 }
  0xe4   :  { %492 = shalt.err (!%p489_p9)
}
  0xe5   :  { %370 = dma.vmem_to_hbm [thread:$0]  %s368_s22, 16, %s616_s3, [#allocation5]  }
  0xe6   :  { %503 = dma.done.wait [#allocation5], 16  }
  0xe7   :  { %504 = vsyncadd [#allocation5], 4294967280 }
  0xe8   :  { %374 = vsyncpa [#allocation4], 1 }
  0xe9   :  { %375 = vsyncpa [#allocation5], 1 }

</bundles_post_ra>
